<compile_context>
chip_gen: v7x
topology: tpu7x:2x2x1
jax: 0.10.0
libtpu: 0.0.40
codegen_flags: <defaults>
</compile_context>

<pallas_src>
import jax
import jax.numpy as jnp
import numpy as np
from jax import lax
from jax.experimental import pallas as pl
from jax.experimental.pallas import tpu as pltpu


def _round_up(a, b):
    return ((a + b - 1) // b) * b


def _event_frame_kernel(ev_ref, out_ref, acc_ref):
    h_idx = pl.program_id(0)
    w_idx = pl.program_id(1)
    n_idx = pl.program_id(2)

    two_hb, tw = acc_ref.shape
    hb = two_hb // 2
    tn = ev_ref.shape[1]

    @pl.when(n_idx == 0)
    def _():
        acc_ref[...] = jnp.zeros_like(acc_ref)

    ev = ev_ref[...]                       # (3, TN) int32: [x, y, p01]
    xi = ev[0:1, :]                        # (1, TN)
    yi = ev[1:2, :]
    pi = ev[2:3, :]                        # 0 / 1

    # Column target within the current W tile.
    x_local = xi - w_idx * tw              # (1, TN)

    # Row target within this H block, with polarity folded into the row index.
    lo = h_idx * hb
    y_local = yi - lo
    in_block = (y_local >= 0) & (y_local < hb)
    row_tgt = jnp.where(in_block, y_local + pi * hb, -1)   # (1, TN)

    # One-hot operands (cast the compare directly -- no select).
    iota_r = lax.broadcasted_iota(jnp.int32, (two_hb, tn), 0)
    oh_r = (iota_r == row_tgt).astype(jnp.bfloat16)        # (2*HB, TN)

    iota_c = lax.broadcasted_iota(jnp.int32, (tw, tn), 0)
    oh_c = (iota_c == x_local).astype(jnp.bfloat16)        # (TW, TN)

    # Per-(row, polarity, column) event counts on the MXU: acc += oh_r @ oh_c^T
    dn = (((1,), (1,)), ((), ()))          # contract over TN
    acc_ref[...] += lax.dot_general(oh_r, oh_c, dn,
                                    preferred_element_type=jnp.float32)

    @pl.when(n_idx == pl.num_programs(2) - 1)
    def _():
        acc = acc_ref[...]
        # Binarize each polarity half (counts are exact ints in f32) and sum.
        out_ref[...] = (jnp.minimum(acc[:hb, :], 1.0)
                        + jnp.minimum(acc[hb:, :], 1.0))


def quantization_layer_event_frame(events, dim, *, tn_cap=2048):
    """Pallas equivalent of QuantizationLayerEventFrame.forward.

    events: (N, 4) float array of (x, y, t, p), p in {-1, +1}, integer coords
            0 <= x < W, 0 <= y < H.
    dim:    (H, W)
    returns (1, 1, H, W) float32 with values in {0, 1, 2}.
    """
    H, W = dim
    N = int(events.shape[0])

    # --- geometry -----------------------------------------------------------
    # 2-way H split keeps a "parallel" grid axis for v7x megacore; h_block is
    # sublane-aligned so both polarity halves of the accumulator stay aligned.
    num_h = 2 if H > 8 else 1
    h_block = _round_up(max(1, -(-H // num_h)), 8)
    h_pad = num_h * h_block

    if W <= 2048:
        w_pad = max(128, _round_up(W, 128))
        tw = w_pad                          # collapse W -> single lane-dense tile
    else:
        tw = 512
        w_pad = _round_up(W, tw)
    num_w = w_pad // tw

    # Deep contraction tile (amortizes step overhead + accumulator RMW).
    tn = max(128, min(tn_cap, _round_up(max(N, 1), 128)))
    n_pad = _round_up(max(N, 1), tn)
    num_n = n_pad // tn

    # --- event preprocessing (lane-dense packed int32 rows) -----------------
    ev = events.astype(jnp.float32)
    xi = ev[:, 0].astype(jnp.int32)
    yi = ev[:, 1].astype(jnp.int32)
    pi = ((ev[:, 3] + 1.0) * 0.5).astype(jnp.int32)        # {-1,+1} -> {0,1}
    # t (ev[:, 2]) is normalized in the reference but never affects the output.

    pad = n_pad - N
    xi = jnp.pad(xi, (0, pad), constant_values=-1)
    yi = jnp.pad(yi, (0, pad), constant_values=-1)
    pi = jnp.pad(pi, (0, pad), constant_values=0)
    ev_packed = jnp.stack([xi, yi, pi], axis=0)            # (3, N_pad) int32

    # --- VMEM budget (cap at 48 MiB for v7x's 64 MiB physical VMEM) ---------
    est = (8 * tn * 4 * 2                   # packed event block (sublane-padded), dbl-buf
           + h_block * tw * 4 * 2           # output block, dbl-buf
           + 2 * h_block * tw * 4           # f32 accumulator scratch
           + (2 * h_block + tw) * tn * 2)   # bf16 one-hot intermediates
    vmem_limit = int(min(48 << 20, max(32 << 20, 2 * est)))

    out = pl.pallas_call(
        _event_frame_kernel,
        out_shape=jax.ShapeDtypeStruct((h_pad, w_pad), jnp.float32),
        grid=(num_h, num_w, num_n),
        in_specs=[pl.BlockSpec((3, tn), lambda h, w, n: (0, n))],
        out_specs=pl.BlockSpec((h_block, tw), lambda h, w, n: (h, w)),
        scratch_shapes=[pltpu.VMEM((2 * h_block, tw), jnp.float32)],
        compiler_params=pltpu.CompilerParams(
            dimension_semantics=("parallel", "parallel", "arbitrary"),
            vmem_limit_bytes=vmem_limit),
    )(ev_packed)

    return out[:H, :W].reshape(1, 1, H, W)


def reference_numpy(events_np, dim):
    """Direct port of the PyTorch forward (scatter-add based)."""
    H, W = dim
    vox = np.zeros(2 * H * W, dtype=np.float32)
    x, y, t, p = events_np.T
    p01 = (p + 1.0) / 2.0
    idx = (x + W * y + W * H * p01).astype(np.int64)
    np.add.at(vox, idx, 1.0)
    vox[vox > 0] = 1.0
    vox = vox.reshape(-1, 2, H, W)
    event_frame = vox.sum(axis=1).reshape(-1, 1, H, W)
    return event_frame


if __name__ == "__main__":
    # Small shapes; H=13 / W=18 exercise sublane (H->2x8) and lane (W->128)
    # padding, the 2-way H-block parallel split, and output trimming.
    H, W = 13, 18
    N = 100

    key = jax.random.PRNGKey(0)
    kx, ky, kt, kp = jax.random.split(key, 4)
    xs = jax.random.randint(kx, (N,), 0, W).astype(jnp.float32)
    ys = jax.random.randint(ky, (N,), 0, H).astype(jnp.float32)
    ts = jax.random.uniform(kt, (N,), minval=0.1, maxval=1.0)
    ps = jnp.where(jax.random.bernoulli(kp, 0.5, (N,)), 1.0, -1.0)
    events = jnp.stack([xs, ys, ts, ps], axis=1).astype(jnp.float32)  # (N, 4)

    out = quantization_layer_event_frame(events, (H, W))
    out = jax.block_until_ready(out)

    ref = reference_numpy(np.asarray(events), (H, W))
    np.testing.assert_allclose(np.asarray(out), ref, rtol=0, atol=0)

    print("KERNEL_OK")
</pallas_src>

<mosaic_0001>
module attributes {stable_mosaic.version = 11 : i64} {
  func.func @_event_frame_kernel(%arg0: i32, %arg1: i32, %arg2: i32, %arg3: memref<3x128xi32, #tpu.memory_space<vmem>>, %arg4: memref<8x128xf32, #tpu.memory_space<vmem>>, %arg5: memref<16x128xf32, #tpu.memory_space<vmem>>) attributes {dimension_semantics = [#tpu.dimension_semantics<parallel>, #tpu.dimension_semantics<parallel>, #tpu.dimension_semantics<arbitrary>], iteration_bounds = array<i64: 2, 1, 1>, scalar_prefetch = 0 : i64, scratch_operands = 1 : i64, tpu.core_type = #tpu.core_type<tc>, window_params = [{transform_indices = @transform_0, window_bounds = array<i64: 3, 128>}, {transform_indices = @transform_1, window_bounds = array<i64: 8, 128>}]} {
    %c0_i32 = arith.constant 0 : i32
    %0 = arith.cmpi eq, %arg2, %c0_i32 : i32
    %1 = arith.extui %0 : i1 to i32
    %c0_i32_0 = arith.constant 0 : i32
    %2 = arith.cmpi ne, %1, %c0_i32_0 : i32
    scf.if %2 {
      %cst_11 = arith.constant 0.000000e+00 : f32
      %42 = vector.broadcast %cst_11 : f32 to vector<16x128xf32>
      %c0_12 = arith.constant 0 : index
      %c0_13 = arith.constant 0 : index
      %43 = vector.load %arg5[%c0_12, %c0_13] : memref<16x128xf32, #tpu.memory_space<vmem>>, vector<16x128xf32>
      tpu.vector_store %arg5[%c0_12, %c0_13], %42 {strides = array<i32>} : memref<16x128xf32, #tpu.memory_space<vmem>>, vector<16x128xf32>,
    } else {
    }
    %c0 = arith.constant 0 : index
    %c0_1 = arith.constant 0 : index
    %3 = vector.load %arg3[%c0, %c0_1] : memref<3x128xi32, #tpu.memory_space<vmem>>, vector<3x128xi32>
    %4 = vector.extract_strided_slice %3 {offsets = [0, 0], sizes = [1, 128], strides = [1, 1]} : vector<3x128xi32> to vector<1x128xi32>
    %5 = vector.extract_strided_slice %3 {offsets = [1, 0], sizes = [1, 128], strides = [1, 1]} : vector<3x128xi32> to vector<1x128xi32>
    %6 = vector.extract_strided_slice %3 {offsets = [2, 0], sizes = [1, 128], strides = [1, 1]} : vector<3x128xi32> to vector<1x128xi32>
    %c128_i32 = arith.constant 128 : i32
    %7 = arith.muli %arg1, %c128_i32 : i32
    %8 = vector.broadcast %7 : i32 to vector<1x128xi32>
    %9 = arith.subi %4, %8 : vector<1x128xi32>
    %c8_i32 = arith.constant 8 : i32
    %10 = arith.muli %arg0, %c8_i32 : i32
    %11 = vector.broadcast %10 : i32 to vector<1x128xi32>
    %12 = arith.subi %5, %11 : vector<1x128xi32>
    %c0_i32_2 = arith.constant 0 : i32
    %13 = vector.broadcast %c0_i32_2 : i32 to vector<1x128xi32>
    %14 = arith.cmpi sge, %12, %13 : vector<1x128xi32>
    %c8_i32_3 = arith.constant 8 : i32
    %15 = vector.broadcast %c8_i32_3 : i32 to vector<1x128xi32>
    %16 = arith.cmpi slt, %12, %15 : vector<1x128xi32>
    %17 = arith.andi %14, %16 : vector<1x128xi1>
    %c8_i32_4 = arith.constant 8 : i32
    %18 = vector.broadcast %c8_i32_4 : i32 to vector<1x128xi32>
    %19 = arith.muli %6, %18 : vector<1x128xi32>
    %20 = arith.addi %12, %19 : vector<1x128xi32>
    %c-1_i32 = arith.constant -1 : i32
    %21 = vector.broadcast %c-1_i32 : i32 to vector<1x128xi32>
    %22 = arith.select %17, %20, %21 : vector<1x128xi1>, vector<1x128xi32>
    %23 = tpu.iota {dimensions = array<i32: 0>} : vector<16x128xi32>
    %24 = vector.broadcast %22 : vector<1x128xi32> to vector<16x128xi32>
    %25 = arith.cmpi eq, %23, %24 : vector<16x128xi32>
    %26 = arith.extui %25 : vector<16x128xi1> to vector<16x128xi32>
    %27 = arith.sitofp %26 : vector<16x128xi32> to vector<16x128xf32>
    %28 = arith.truncf %27 : vector<16x128xf32> to vector<16x128xbf16>
    %29 = tpu.iota {dimensions = array<i32: 0>} : vector<128x128xi32>
    %30 = vector.broadcast %9 : vector<1x128xi32> to vector<128x128xi32>
    %31 = arith.cmpi eq, %29, %30 : vector<128x128xi32>
    %32 = arith.extui %31 : vector<128x128xi1> to vector<128x128xi32>
    %33 = arith.sitofp %32 : vector<128x128xi32> to vector<128x128xf32>
    %34 = arith.truncf %33 : vector<128x128xf32> to vector<128x128xbf16>
    %c0_5 = arith.constant 0 : index
    %c0_6 = arith.constant 0 : index
    %35 = vector.load %arg5[%c0_5, %c0_6] : memref<16x128xf32, #tpu.memory_space<vmem>>, vector<16x128xf32>
    %cst = arith.constant dense<0.000000e+00> : vector<16x128xf32>
    %36 = tpu.matmul %28, %34, %cst {dimension_numbers = #tpu.dot_dimension_numbers<[1], [1], [0], [0], [0, 0, 1, 0], [], []>} : vector<16x128xbf16>, vector<128x128xbf16>, vector<16x128xf32> -> vector<16x128xf32>
    %37 = arith.addf %35, %36 : vector<16x128xf32>
    %c0_7 = arith.constant 0 : index
    %c0_8 = arith.constant 0 : index
    %38 = vector.load %arg5[%c0_7, %c0_8] : memref<16x128xf32, #tpu.memory_space<vmem>>, vector<16x128xf32>
    tpu.vector_store %arg5[%c0_7, %c0_8], %37 {strides = array<i32>} : memref<16x128xf32, #tpu.memory_space<vmem>>, vector<16x128xf32>,
    %c0_i32_9 = arith.constant 0 : i32
    %39 = arith.cmpi eq, %arg2, %c0_i32_9 : i32
    %40 = arith.extui %39 : i1 to i32
    %c0_i32_10 = arith.constant 0 : i32
    %41 = arith.cmpi ne, %40, %c0_i32_10 : i32
    scf.if %41 {
      %c0_11 = arith.constant 0 : index
      %c0_12 = arith.constant 0 : index
      %42 = vector.load %arg5[%c0_11, %c0_12] : memref<16x128xf32, #tpu.memory_space<vmem>>, vector<16x128xf32>
      %43 = vector.extract_strided_slice %42 {offsets = [0, 0], sizes = [8, 128], strides = [1, 1]} : vector<16x128xf32> to vector<8x128xf32>
      %cst_13 = arith.constant 1.000000e+00 : f32
      %44 = vector.broadcast %cst_13 : f32 to vector<8x128xf32>
      %45 = arith.minimumf %43, %44 : vector<8x128xf32>
      %46 = vector.extract_strided_slice %42 {offsets = [8, 0], sizes = [8, 128], strides = [1, 1]} : vector<16x128xf32> to vector<8x128xf32>
      %cst_14 = arith.constant 1.000000e+00 : f32
      %47 = vector.broadcast %cst_14 : f32 to vector<8x128xf32>
      %48 = arith.minimumf %46, %47 : vector<8x128xf32>
      %49 = arith.addf %45, %48 : vector<8x128xf32>
      %c0_15 = arith.constant 0 : index
      %c0_16 = arith.constant 0 : index
      %50 = vector.load %arg4[%c0_15, %c0_16] : memref<8x128xf32, #tpu.memory_space<vmem>>, vector<8x128xf32>
      tpu.vector_store %arg4[%c0_15, %c0_16], %49 {strides = array<i32>} : memref<8x128xf32, #tpu.memory_space<vmem>>, vector<8x128xf32>,
    } else {
    }
    return
  }
  func.func @transform_0(%arg0: i32, %arg1: i32, %arg2: i32) -> (i32, i32) {
    %c0_i32 = arith.constant 0 : i32
    %c0_i32_0 = arith.constant 0 : i32
    return %c0_i32, %arg2 : i32, i32
  }
  func.func @transform_1(%arg0: i32, %arg1: i32, %arg2: i32) -> (i32, i32) {
    %c0_i32 = arith.constant 0 : i32
    return %arg0, %arg1 : i32, i32
  }
}

</mosaic_0001>

<bundles_post_ra>
// kernel: tpu_custom_call.1
= control target key start
LH: loop header
LB: loop body
LE: loop exit
PB: predicated region body
PF: predicated region fallthrough
CT: control target
= control target key end

     0   :  { %6 = vsyncpa [#allocation4], 0  ;;  %s862_s0 = inlined_call_operand.hbm [shape: s32[3,128], index: 0, kind: input, shape index: {}]   ;;  %s863_s1 = inlined_call_operand.hbm [shape: f32[16,128], index: 1, kind: output, shape index: {}]  }
   0x1   :  { %7 = vsyncpa [#allocation5], 0 }
   0x2   :  { %9 = vsyncpa [#allocation5 + $0x1], 0  ;;  %s662_s6 = smov 0   ;;  %s664_s7 = smov 0  }
   0x3   :  { %s666_s8 = smov 0   ;;  %s668_s9 = smov 0  }
   0x4   :  { %s670_s10 = smov 0   ;;  %s672_s11 = smov 0  }
   0x5 LB: > { %s389_s12 = sadd.s32 4294967295, %s645_s11   ;;  %s390_s13 = sadd.s32 4294967294, %s645_s11   ;;  %s645_s11 = sphi %s672_s11, %s15_s11   ;;  %s641_s10 = sphi %s670_s10, %s883_s10   ;;  %s637_s9 = sphi %s668_s9, %s882_s9   ;;  %s633_s8 = sphi %s666_s8, %s881_s8   ;;  %s629_s7 = sphi %s664_s7, %s880_s7   ;;  %s625_s6 = sphi %s662_s6, %s879_s6  }
   0x6   : > { %s34_s14 = sadd.s32 1, %s641_s10  ;;  %s69_s15 = sadd.s32 1, %s633_s8 }
   0x7   : > { %p36_p0 = scmp.ge.s32.totalorder %s34_s14, 2  ;;  %p79_p1 = scmp.ne.s32.totalorder %s633_s8, %s629_s7 }
   0x8   : > { %p80_p2 = scmp.eq.s32.totalorder %s389_s12, 1  ;;  %p85_p3 = scmp.ne.s32.totalorder %s629_s7, %s625_s6 }
   0x9   : > { %s885_s14 = smov (%p36_p0, %s34_s14), 0  ;;  %p86_p5 = scmp.eq.s32.totalorder %s390_s13, 1 }
   0xa   : > { %p702_p4 = por %p80_p2, %p79_p1  ;;  %s64_s17 = ssub.s32 %s641_s10, %s885_s14 }
   0xb   : > { %p391_p6 = scmp.ge.s32.totalorder %s645_s11, 1  ;;  %p67_p7 = scmp.eq.s32.totalorder %s64_s17, 0 }
   0xc   : > { %s868_s16 = scalar_select %p702_p4, 1, 0 }
   0xd   : > { %p709_p8 = por %p86_p5, %p85_p3  ;;  %p93_p9 = scmp.lt.s32.totalorder %s645_s11, 3 }
   0xe   : > { %s715_s19 = scalar_select %p67_p7, %s633_s8, %s69_s15  }
   0xf   : > { %s869_s18 = scalar_select %p709_p8, 1, 0 }
  0x10   : > { %p717_p10 = pnand %p391_p6, %p93_p9  ;;  %p721_p11 = scmp.eq.s32.totalorder %s389_s12, 0 }
  0x11   : > { %s647_s22 = smov [#allocation3]   ;;  %s535_s27 = scalar_lea.hbm %s862_s0, 64 }
  0x12   : > { %s870_s20 = scalar_select %p717_p10, 1, 0 }
  0x13   : > { %s871_s21 = scalar_select %p721_p11, 1, 0 }
  0x14   : > { %p472_p12 = pneg %p717_p10  ;;  %s108_s23 = sshll.u32 %s647_s22, 4  ;;  %s109_s23 = int_to_ptr.vmem [resolvable:$true] %s108_s23 }
  0x15   : > { %p536_p0 = scmp.ne.s32.totalorder %s862_s0, %s535_s27  ;;  %p542_p5 = scmp.lt.u32.totalorder %s535_s27, %s862_s0 }
  0x16   : > { %p729_p13 = pnand %p721_p11, %p472_p12 }
  0x18   : > { %p537_p1 = pneg %p729_p13 }
  0x1a   : > { %p538_p2 = pnand %p537_p1, %p536_p0 }
  0x1c   : > { %p539_p3 = pneg %p538_p2 }
  0x1e   : > { %p544_p6 = pnand %p542_p5, %p539_p3 }
  0x20   : > { %547 = shalt.err (!%p544_p6)
}
  0x21   : > { %s548_s3 = scalar_lea.vmem %s109_s23, 64  ;;  %p556_p8 = scmp.lt.s32.totalorder %s109_s23, %s109_s23 }
  0x22   : > { %p549_p7 = scmp.ne.s32.totalorder %s109_s23, %s548_s3  ;;  %p557_p4 = scmp.lt.s32.totalorder %s548_s3, %s548_s3 }
  0x24   : > { %p551_p9 = pnand %p549_p7, %p537_p1  ;;  %p558_p11 = por %p557_p4, %p556_p8 }
  0x26   : > { %p552_p12 = pneg %p551_p9 }
  0x28   : > { %p559_p10 = pnand %p558_p11, %p552_p12 }
  0x2a   : > { %562 = shalt.err (!%p559_p10)
}
  0x2b   : > { %475 = dma.hbm_to_vmem [thread:$0]  (!%p729_p13), %s862_s0, 64, %s109_s23, [#allocation4]  }
  0x2c   : > { %p873_p0 = scmp.ne.s32.totalorder %s870_s20, 0 }
  0x2d   : > { %p874_p2 = scmp.ne.s32.totalorder (!%p873_p0), %s871_s21, 0 }
  0x2e   : > { %121 = sbr.rel (%p873_p0) target bundleno = 359 (0x167), region = 24 }
  0x35   : > { %616 = dma.done.wait (%p874_p2), [#allocation4], 64  }
  0x36   : > { %618 = vsyncadd (%p874_p2), [#allocation4], 4294967232  ;;  %v157_v0 = vlaneseq  ;;  %v648_v1 = vmov 0.0   ;;  %vm649_vm0 = vmmov 0   ;;  %s396_s12 = sshll.u32 %s637_s9, 3  ;;  %s133_s13 = sand.u32 1, %s629_s7  }
  0x37   : > { %446 = vmatprep.subr.bf16.mxu0 %v648_v1  ;;  %462 = vmatprep.mubr.msk.bf16.mxu0 %vm649_vm0, %v648_v1  ;;  %v143_v5 = vld [vmem:[#allocation3] sm:$0x7]  ;;  %v148_v8 = vstv %s396_s12  ;;  %v650_v11 = vmov 1.0|1.0   ;;  %s395_s15 = sshll.u32 %s133_s13, 3  ;;  %s434_s17 = sshll.u32 %s637_s9, 7 }
  0x38   : > { %v757_v2 = vshrl.u32 %v157_v0, 7  ;;  %v153_v10 = vmul.u32 8, %v143_v5  ;;  %v149_v12 = vsub.s32 %v143_v5, %v148_v8  ;;  %s135_s20 = scalar_lea.vmem [#allocation6], %s395_s15  ;;  %s815_s24 = scalar_lea.hbm %s863_s1, %s434_s17 }
  0x39   : > { %s316_s21 = sshll.u32 %s135_s20, 4  ;;  %s302_s25 = scalar_lea.sflag [#allocation5], %s133_s13  ;;  %s817_s21 = int_to_ptr.vmem [resolvable:$true] %s316_s21 }
  0x3a   : > { %v187_v3 = vsub.s32 0, %v757_v2  ;;  %v159_v4 = vadd.s32 8, %v757_v2  ;;  %v171_v7 = vadd.s32 16, %v757_v2  ;;  %v172_v9 = vadd.s32 24, %v757_v2  ;;  %s563_s26 = scalar_lea.vmem %s817_s21, 128  ;;  %p877_p8 = scmp.ne.s32.totalorder %s868_s16, 0 }
  0x3b   : > { %v154_v13 = vrot.slane %v153_v10, 1  ;;  %vm150_vm6 = vcmp.ge.s32.totalorder %v149_v12, 0  ;;  %vm151_vm7 = vcmp.lt.s32.totalorder %v149_v12, 8  ;;  %v162_v15 = vsub.s32 1, %v757_v2  ;;  %p564_p4 = scmp.ne.s32.totalorder %s817_s21, %s563_s26  ;;  %s651_s9 = smov [#allocation6]  }
  0x3c   : > { %v762_v6 = vrot.slane %v143_v5, %v187_v3  ;;  %v173_v16 = vadd.s32 32, %v757_v2  ;;  %v174_v17 = vadd.s32 40, %v757_v2  ;;  %vm152_vm9 = vmand %vm150_vm6, %vm151_vm7  ;;  %v175_v21 = vadd.s32 48, %v757_v2  ;;  %s567_s27 = sshll.u32 %s651_s9, 4  ;;  %s568_s27 = int_to_ptr.vmem [resolvable:$false] %s567_s27 }
  0x3d   : > { %v155_v14 = vadd.s32 %v154_v13, %v149_v12  ;;  %v176_v22 = vadd.s32 56, %v757_v2  ;;  %v177_v23 = vadd.s32 64, %v757_v2  ;;  %v178_v24 = vadd.s32 72, %v757_v2  ;;  %p565_p10 = pnand %p564_p4, %p877_p8  ;;  %s569_s28 = scalar_lea.vmem %s568_s27, 256 }
  0x3e   : > { %vm189_vm1 = vcmp.eq.s32.totalorder %v757_v2, %v762_v6  ;;  %vm190_vm2 = vcmp.eq.s32.totalorder %v159_v4, %v762_v6  ;;  %vm191_vm4 = vcmp.eq.s32.totalorder %v171_v7, %v762_v6  ;;  %vm192_vm5 = vcmp.eq.s32.totalorder %v172_v9, %v762_v6  ;;  %p570_p13 = scmp.lt.s32.totalorder %s817_s21, %s568_s27  ;;  %p571_p1 = scmp.lt.s32.totalorder %s569_s28, %s563_s26 }
  0x3f   : > { %vm415_vm3 = vmpackc.low %vm190_vm2, %vm189_vm1  ;;  %v156_v18 = vsel %vm152_vm9, %v155_v14, 4294967295  ;;  %vm193_vm10 = vcmp.eq.s32.totalorder %v173_v16, %v762_v6  ;;  %vm194_vm11 = vcmp.eq.s32.totalorder %v174_v17, %v762_v6  ;;  %vm195_vm0 = vcmp.eq.s32.totalorder %v175_v21, %v762_v6  ;;  %p566_p11 = pneg %p565_p10 }
  0x40   : > { %447 = vmatpush3.bf16.xpose.msk.msra.mxu0 %vm415_vm3, %v650_v11  ;;  %vm417_vm8 = vmpackc.low %vm192_vm5, %vm191_vm4  ;;  %v163_v19 = vrot.slane %v156_v18, %v162_v15  ;;  %vm196_vm1 = vcmp.eq.s32.totalorder %v176_v22, %v762_v6  ;;  %vm197_vm3 = vcmp.eq.s32.totalorder %v177_v23, %v762_v6  ;;  %vm198_vm4 = vcmp.eq.s32.totalorder %v178_v24, %v762_v6  ;;  %p572_p3 = por %p571_p1, %p570_p13 }
  0x41   : > { %448 = vmatprep.subr.bf16.mxu0 %v648_v1  ;;  %vm419_vm15 = vmpackc.low %vm194_vm11, %vm193_vm10  ;;  %v179_v25 = vadd.s32 80, %v757_v2  ;;  %v180_v26 = vadd.s32 88, %v757_v2  ;;  %v181_v27 = vadd.s32 96, %v757_v2  ;;  %v182_v28 = vadd.s32 104, %v757_v2 }
  0x42   : > { %vm164_vm12 = vcmp.eq.s32.totalorder %v757_v2, %v163_v19  ;;  %vm165_vm13 = vcmp.eq.s32.totalorder %v159_v4, %v163_v19  ;;  %vm421_vm2 = vmpackc.low %vm196_vm1, %vm195_vm0  ;;  %v183_v29 = vadd.s32 112, %v757_v2  ;;  %v184_v30 = vadd.s32 120, %v757_v2  ;;  %p573_p5 = pnand %p572_p3, %p566_p11 }
  0x43   : > { %vm779_vm14 = vmpackc.low %vm165_vm13, %vm164_vm12  ;;  %vm199_vm6 = vcmp.eq.s32.totalorder %v179_v25, %v762_v6  ;;  %vm200_vm7 = vcmp.eq.s32.totalorder %v180_v26, %v762_v6  ;;  %vm201_vm9 = vcmp.eq.s32.totalorder %v181_v27, %v762_v6  ;;  %vm202_vm10 = vcmp.eq.s32.totalorder %v182_v28, %v762_v6 }
  0x44   : > { %vm423_vm5 = vmpackc.low %vm198_vm4, %vm197_vm3  ;;  %vm203_vm12 = vcmp.eq.s32.totalorder %v183_v29, %v762_v6  ;;  %vm204_vm13 = vcmp.eq.s32.totalorder %v184_v30, %v762_v6 }
  0x45   : > { %vm427_vm11 = vmpackc.low %vm202_vm10, %vm201_vm9 }
  0x48   : > { %449 = vmatpush3.bf16.xpose.msk.msra.mxu0 %vm417_vm8, %v650_v11  ;;  %vm425_vm8 = vmpackc.low %vm200_vm7, %vm199_vm6 }
  0x49   : > { %450 = vmatprep.subr.bf16.mxu0 %v648_v1 }
  0x50   : > { %451 = vmatpush3.bf16.xpose.msk.msra.mxu0 %vm419_vm15, %v650_v11  ;;  %vm429_vm15 = vmpackc.low %vm204_vm13, %vm203_vm12 }
  0x51   : > { %452 = vmatprep.subr.bf16.mxu0 %v648_v1 }
  0x58   : > { %453 = vmatpush3.bf16.xpose.msk.msra.mxu0 %vm421_vm2, %v650_v11 }
  0x59   : > { %454 = vmatprep.subr.bf16.mxu0 %v648_v1 }
  0x60   : > { %455 = vmatpush3.bf16.xpose.msk.msra.mxu0 %vm423_vm5, %v650_v11 }
  0x61   : > { %456 = vmatprep.subr.bf16.mxu0 %v648_v1 }
  0x68   : > { %457 = vmatpush3.bf16.xpose.msk.msra.mxu0 %vm425_vm8, %v650_v11 }
  0x69   : > { %458 = vmatprep.subr.bf16.mxu0 %v648_v1 }
  0x70   : > { %459 = vmatpush3.bf16.xpose.msk.msra.mxu0 %vm427_vm11, %v650_v11 }
  0x71   : > { %460 = vmatprep.subr.bf16.mxu0 %v648_v1 }
  0x78   : > { %461 = vmatpush3.bf16.xpose.msk.msra.mxu0 %vm429_vm15, %v650_v11 }
  0x7f   : > { %463 = vmatmul.mubr.msk.bf16.vlgmr.msra.gmra.mrb[0].mxu0 %vm779_vm14, %v650_v11 }
 0x152   : > { %v281_v31 = vpop.f32.mrb[0].mxu0 }
 0x153   : > { %v464_v32 = vpop.f32.mrb[1].mxu0  ;;  %v297_v34 = vmin.f32 %v281_v31, 1.0 }
 0x154   : > { %v284_v33 = vpop.f32.mrb[2].mxu0 }
 0x155   : > { %v298_v35 = vmin.f32 %v284_v33, 1.0  ;;  %v465_v36 = vpop.f32.mrb[3].mxu0 }
 0x157   : > { %v299_v37 = vadd.f32 %v298_v35, %v297_v34 }
 0x159   : > { %300 = vst [vmem:[%s135_s20] sm:$0xff] %v299_v37 }
 0x15a   : > { %576 = shalt.err (!%p573_p5)
}
 0x15b   : > { %s577_s29 = scalar_lea.hbm %s815_s24, 128  ;;  %s581_s3 = scalar_lea.hbm %s863_s1, 256 }
 0x15c   : > { %p578_p6 = scmp.ne.s32.totalorder %s815_s24, %s577_s29  ;;  %p582_p12 = scmp.lt.u32.totalorder %s815_s24, %s863_s1 }
 0x15d   : > { %p583_p0 = scmp.lt.u32.totalorder %s581_s3, %s577_s29  ;;  %p585_p4 = scmp.lt.u32.totalorder %s577_s29, %s815_s24 }
 0x15e   : > { %p579_p7 = pnand %p578_p6, %p877_p8 }
 0x15f   : > { %p584_p2 = por %p583_p0, %p582_p12 }
 0x160   : > { %p580_p9 = pneg %p579_p7 }
 0x161   : > { %p586_p10 = por %p585_p4, %p584_p2 }
 0x163   : > { %p587_p11 = pnand %p586_p10, %p580_p9 }
 0x165   : > { %590 = shalt.err (!%p587_p11)
}
 0x166   : > { %470 = dma.vmem_to_hbm [thread:$0]  (%p877_p8), %s817_s21, 128, %s815_s24, %s302_s25  }
 0x167 PF: > { %p482_p13 = scmp.ge.s32.totalorder %s645_s11, 2  ;;  %s328_s12 = sand.u32 1, %s625_s6  }
 0x168   : > { %p878_p1 = scmp.ne.s32.totalorder %s869_s18, 0  ;;  %s329_s13 = scalar_lea.sflag [#allocation5], %s328_s12 }
 0x16a   : > { %p477_p3 = pnand %p482_p13, %p878_p1 }
 0x16c   : > { %620 = dma.done.wait (!%p477_p3), %s329_s13, 128  }
 0x16d   : > { %622 = vsyncadd (!%p477_p3), %s329_s13, 4294967168  ;;  %s15_s11 = sadd.s32 1, %s645_s11   ;;  %s879_s6 = smov %s629_s7 }
 0x16e   : > { %p12_p5 = scmp.ge.s32.totalorder %s15_s11, 4   ;;  %s880_s7 = smov %s633_s8 }
 0x16f   : > { %s881_s8 = smov %s715_s19  ;;  %s882_s9 = smov %s641_s10 }
 0x170   : > { %s883_s10 = smov %s885_s14  ;;  %14 = sbr.rel (!%p12_p5) target bundleno = 5 (0x5), region = 70 }
 0x177   :  { %334 = vsyncpa [#allocation4], 1 }
 0x178   :  { %336 = vsyncpa [#allocation4 + $0x1], 1 }
 0x179   :  { %337 = vsyncpa [#allocation5], 1 }
 0x17a   :  { %339 = vsyncpa [#allocation5 + $0x1], 1 }

</bundles_post_ra>
